<compile_context>
chip_gen: v7x
topology: tpu7x:2x2x1
jax: 0.10.0
libtpu: 0.0.40
codegen_flags: <defaults>
</compile_context>

<pallas_src>
import jax
import jax.numpy as jnp
from jax.experimental import pallas as pl
from jax.experimental.pallas import tpu as pltpu


def _critic_kernel(x_ref, w1_ref, b1_ref, w2_ref, b2_ref, w3_ref, b3_ref, o_ref):
    # Layer 1: Linear(input_dims, 64) + ReLU.  (1/n_actions already folded into w1.)
    h1 = jnp.dot(x_ref[...], w1_ref[...], preferred_element_type=jnp.float32)
    h1 = jnp.maximum(h1 + b1_ref[...], 0.0)

    # Layer 2: Linear(64, 32) + ReLU.
    h2 = jnp.dot(h1, w2_ref[...], preferred_element_type=jnp.float32)
    h2 = jnp.maximum(h2 + b2_ref[...], 0.0)

    # Layer 3: Linear(32, 1) value head, lane-dense: contract the feature axis
    # of h2 (tb,32) against the (1,32) w3 row so the batch dimension lands on
    # the lane axis -> (1, tb), stored without lane masking.
    # TODO(synk): bundle-check whether this einsum inserts a per-step XLU
    # transpose of h2; if hot at large tb, compare against h2 @ w3 ((tb,1) +
    # masked stores) or a VPU multiply + cross-lane sum and keep the cheapest.
    v = jnp.einsum("ok,bk->ob", w3_ref[...], h2,
                   preferred_element_type=jnp.float32)      # (1, tb)
    o_ref[...] = v + b3_ref[...]                            # b3 is (1, 1)


def _round_up(n, m):
    return ((n + m - 1) // m) * m


_HBM_TARGET_BYTES = 2 * 1024 * 1024   # x HBM bytes per grid step (amortize step overhead)
_VMEM_DATA_BUDGET = 12 * 1024 * 1024  # conservative data budget across v5e/v6e/v7x
_SPLIT_MIN_ROWS = 1024                # split into >=2 blocks above this (v7x megacore)


def _pick_tile(batch, input_dims, x_itemsize):
    """Pick the batch tile (tb) and the (8-row-rounded) padded batch."""
    b_pad = _round_up(batch, 8)

    # Tile wanted from the HBM-traffic target.
    tb = _round_up(max(_HBM_TARGET_BYTES // max(1, input_dims * x_itemsize), 512), 512)

    # VMEM cap: x is double-buffered and its minor dim is padded to 128 lanes;
    # h1/h2 intermediates are f32 and lane-padded to 128; the (1,tb) f32 output
    # is double-buffered. Weights/biases are tiny and covered by budget slack.
    per_row_bytes = (2 * max(input_dims, 128) * x_itemsize   # x, double-buffered
                     + (128 + 128) * 4                       # h1 + h2 (f32)
                     + 2 * 8 * 4)                            # out row, double-buffered
    cap = max(512, (_VMEM_DATA_BUDGET // per_row_bytes) // 512 * 512)
    tb = min(tb, cap)

    if b_pad <= tb:
        if b_pad >= _SPLIT_MIN_ROWS:
            # v7x has 2 TensorCores: guarantee >= 2 grid blocks so "parallel"
            # actually shards the work (no-op cost on single-TC v5e/v6e).
            tb = _round_up(pl.cdiv(b_pad, 2), 128)
        else:
            tb = b_pad   # single full-extent block for small batches
    return tb, b_pad


def prepare_params(params, n_actions):
    """One-time transform of the (in,out)-layout params into kernel layout."""
    return {
        "w1": params["w1"] / float(n_actions),  # fold x / n_actions into layer 1
        "b1": params["b1"],
        "w2": params["w2"],
        "b2": params["b2"],
        "w3t": params["w3"].T,                  # (1, 32) row for the lane-dense value head
        "b3": params["b3"],                     # (1, 1)
    }


def critic_forward(x, kparams):
    """Pallas-backed CriticNetwork.forward.

    x: (batch, input_dims), float32 or bfloat16 (bf16 halves the x HBM stream
       on v6e/v7x; accumulation stays float32).
    kparams: output of prepare_params(...)
    returns: (batch, 1) float32
    """
    batch, input_dims = x.shape
    x_itemsize = jnp.dtype(x.dtype).itemsize

    tb, b_pad = _pick_tile(batch, input_dims, x_itemsize)
    if b_pad != batch:
        x = jnp.pad(x, ((0, b_pad - batch), (0, 0)))
    num_blocks = pl.cdiv(b_pad, tb)

    const2 = lambda i: (0, 0)  # parameters: same block every step -> VMEM resident

    w_bytes = sum(int(kparams[k].size) * jnp.dtype(kparams[k].dtype).itemsize
                  for k in ("w1", "b1", "w2", "b2", "w3t", "b3"))
    cost = pl.CostEstimate(
        flops=2 * b_pad * (input_dims * 64 + 64 * 32 + 32),
        transcendentals=0,
        bytes_accessed=b_pad * input_dims * x_itemsize + b_pad * 4 + w_bytes,
    )

    out = pl.pallas_call(
        _critic_kernel,
        out_shape=jax.ShapeDtypeStruct((1, b_pad), jnp.float32),
        grid=(num_blocks,),
        in_specs=[
            pl.BlockSpec((tb, input_dims), lambda i: (i, 0)),   # x: pipelined over batch
            pl.BlockSpec(kparams["w1"].shape, const2),
            pl.BlockSpec(kparams["b1"].shape, const2),
            pl.BlockSpec(kparams["w2"].shape, const2),
            pl.BlockSpec(kparams["b2"].shape, const2),
            pl.BlockSpec(kparams["w3t"].shape, const2),
            pl.BlockSpec(kparams["b3"].shape, const2),
        ],
        out_specs=pl.BlockSpec((1, tb), lambda i: (0, i)),      # lane-dense row output
        compiler_params=pltpu.CompilerParams(
            dimension_semantics=("parallel",),                   # megacore sharding on v7x
            vmem_limit_bytes=32 * 1024 * 1024,                   # safe on v5e/v6e/v7x
        ),
        cost_estimate=cost,
    )(x, kparams["w1"], kparams["b1"], kparams["w2"], kparams["b2"],
      kparams["w3t"], kparams["b3"])

    return out[0, :batch].reshape(batch, 1)


def init_params(key, input_dims):
    """Deterministic init matching the PyTorch layer shapes (stored as (in, out))."""
    k1, k2, k3, k4, k5, k6 = jax.random.split(key, 6)

    def linear_init(kw, kb, fan_in, fan_out):
        # PyTorch nn.Linear default: U(-1/sqrt(fan_in), 1/sqrt(fan_in))
        bound = 1.0 / jnp.sqrt(jnp.float32(fan_in))
        w = jax.random.uniform(kw, (fan_in, fan_out), jnp.float32, -bound, bound)
        b = jax.random.uniform(kb, (1, fan_out), jnp.float32, -bound, bound)
        return w, b

    w1, b1 = linear_init(k1, k2, input_dims, 64)
    w2, b2 = linear_init(k3, k4, 64, 32)
    w3, b3 = linear_init(k5, k6, 32, 1)
    return {"w1": w1, "b1": b1, "w2": w2, "b2": b2, "w3": w3, "b3": b3}


def reference_forward(x, params, n_actions):
    """Pure-JAX reference matching the PyTorch module."""
    h = x / float(n_actions)
    h = jnp.maximum(h @ params["w1"] + params["b1"], 0.0)
    h = jnp.maximum(h @ params["w2"] + params["b2"], 0.0)
    return h @ params["w3"] + params["b3"]


if __name__ == "__main__":
    n_actions = 4
    input_dims = 16
    batch = 8

    key = jax.random.PRNGKey(0)
    kx, kp = jax.random.split(key)
    x = jax.random.normal(kx, (batch, input_dims), jnp.float32)
    params = init_params(kp, input_dims)
    kparams = prepare_params(params, n_actions)

    # Small batch: single full-extent block.
    out = jax.block_until_ready(critic_forward(x, kparams))
    ref = reference_forward(x, params, n_actions)
    assert out.shape == (batch, 1), out.shape
    assert jnp.allclose(out, ref, atol=1e-5, rtol=1e-5), (out, ref)

    # Larger batch: exercises the >=2-block split, the cdiv grid with a
    # partial final block, and the 8-row remainder pad.
    big_batch = 1037
    xb = jax.random.normal(jax.random.PRNGKey(1), (big_batch, input_dims), jnp.float32)
    out_b = jax.block_until_ready(critic_forward(xb, kparams))
    ref_b = reference_forward(xb, params, n_actions)
    assert out_b.shape == (big_batch, 1), out_b.shape
    assert jnp.allclose(out_b, ref_b, atol=1e-5, rtol=1e-5)

    # bf16-streamed x (caller keeps activations in bf16 on v6e/v7x); f32 accumulation.
    out_h = jax.block_until_ready(critic_forward(xb.astype(jnp.bfloat16), kparams))
    assert out_h.shape == (big_batch, 1), out_h.shape
    assert jnp.allclose(out_h, ref_b, atol=5e-2, rtol=5e-2)

    print("KERNEL_OK")
</pallas_src>

<mosaic_0001>
module attributes {stable_mosaic.version = 11 : i64} {
  func.func @_critic_kernel(%arg0: i32, %arg1: memref<8x16xf32, #tpu.memory_space<vmem>>, %arg2: memref<16x64xf32, #tpu.memory_space<vmem>>, %arg3: memref<1x64xf32, #tpu.memory_space<vmem>>, %arg4: memref<64x32xf32, #tpu.memory_space<vmem>>, %arg5: memref<1x32xf32, #tpu.memory_space<vmem>>, %arg6: memref<1x32xf32, #tpu.memory_space<vmem>>, %arg7: memref<1x1xf32, #tpu.memory_space<vmem>>, %arg8: memref<1x8xf32, #tpu.memory_space<vmem>>) attributes {dimension_semantics = [#tpu.dimension_semantics<parallel>], iteration_bounds = array<i64: 1>, scalar_prefetch = 0 : i64, scratch_operands = 0 : i64, tpu.core_type = #tpu.core_type<tc>, window_params = [{transform_indices = @transform_0, window_bounds = array<i64: 8, 16>}, {pipeline_mode = #tpu.pipeline_mode<synchronous>, transform_indices = @transform_1, window_bounds = array<i64: 16, 64>}, {pipeline_mode = #tpu.pipeline_mode<synchronous>, transform_indices = @transform_2, window_bounds = array<i64: 1, 64>}, {pipeline_mode = #tpu.pipeline_mode<synchronous>, transform_indices = @transform_3, window_bounds = array<i64: 64, 32>}, {pipeline_mode = #tpu.pipeline_mode<synchronous>, transform_indices = @transform_4, window_bounds = array<i64: 1, 32>}, {pipeline_mode = #tpu.pipeline_mode<synchronous>, transform_indices = @transform_5, window_bounds = array<i64: 1, 32>}, {pipeline_mode = #tpu.pipeline_mode<synchronous>, transform_indices = @transform_6, window_bounds = array<i64: 1, 1>}, {transform_indices = @transform_7, window_bounds = array<i64: 1, 8>}]} {
    %c0 = arith.constant 0 : index
    %c0_0 = arith.constant 0 : index
    %0 = vector.load %arg1[%c0, %c0_0] : memref<8x16xf32, #tpu.memory_space<vmem>>, vector<8x16xf32>
    %c0_1 = arith.constant 0 : index
    %c0_2 = arith.constant 0 : index
    %1 = vector.load %arg2[%c0_1, %c0_2] : memref<16x64xf32, #tpu.memory_space<vmem>>, vector<16x64xf32>
    %cst = arith.constant dense<0.000000e+00> : vector<8x64xf32>
    %2 = tpu.matmul %0, %1, %cst {dimension_numbers = #tpu.dot_dimension_numbers<[1], [0], [0], [1], [0, 0, 1, 1], [], []>} : vector<8x16xf32>, vector<16x64xf32>, vector<8x64xf32> -> vector<8x64xf32>
    %c0_3 = arith.constant 0 : index
    %c0_4 = arith.constant 0 : index
    %3 = vector.load %arg3[%c0_3, %c0_4] : memref<1x64xf32, #tpu.memory_space<vmem>>, vector<1x64xf32>
    %4 = vector.broadcast %3 : vector<1x64xf32> to vector<8x64xf32>
    %5 = arith.addf %2, %4 : vector<8x64xf32>
    %cst_5 = arith.constant 0.000000e+00 : f32
    %6 = vector.broadcast %cst_5 : f32 to vector<8x64xf32>
    %7 = arith.maximumf %5, %6 : vector<8x64xf32>
    %c0_6 = arith.constant 0 : index
    %c0_7 = arith.constant 0 : index
    %8 = vector.load %arg4[%c0_6, %c0_7] : memref<64x32xf32, #tpu.memory_space<vmem>>, vector<64x32xf32>
    %cst_8 = arith.constant dense<0.000000e+00> : vector<8x32xf32>
    %9 = tpu.matmul %7, %8, %cst_8 {dimension_numbers = #tpu.dot_dimension_numbers<[1], [0], [0], [1], [0, 0, 1, 1], [], []>} : vector<8x64xf32>, vector<64x32xf32>, vector<8x32xf32> -> vector<8x32xf32>
    %c0_9 = arith.constant 0 : index
    %c0_10 = arith.constant 0 : index
    %10 = vector.load %arg5[%c0_9, %c0_10] : memref<1x32xf32, #tpu.memory_space<vmem>>, vector<1x32xf32>
    %11 = vector.broadcast %10 : vector<1x32xf32> to vector<8x32xf32>
    %12 = arith.addf %9, %11 : vector<8x32xf32>
    %cst_11 = arith.constant 0.000000e+00 : f32
    %13 = vector.broadcast %cst_11 : f32 to vector<8x32xf32>
    %14 = arith.maximumf %12, %13 : vector<8x32xf32>
    %c0_12 = arith.constant 0 : index
    %c0_13 = arith.constant 0 : index
    %15 = vector.load %arg6[%c0_12, %c0_13] : memref<1x32xf32, #tpu.memory_space<vmem>>, vector<1x32xf32>
    "tpu.trace_start"() <{level = 10 : i32, message = "ok,bk->ob"}> : () -> ()
    %cst_14 = arith.constant dense<0.000000e+00> : vector<1x8xf32>
    %16 = tpu.matmul %15, %14, %cst_14 {dimension_numbers = #tpu.dot_dimension_numbers<[1], [1], [0], [0], [0, 0, 1, 0], [], []>} : vector<1x32xf32>, vector<8x32xf32>, vector<1x8xf32> -> vector<1x8xf32>
    "tpu.trace_stop"() : () -> ()
    %c0_15 = arith.constant 0 : index
    %c0_16 = arith.constant 0 : index
    %17 = vector.load %arg7[%c0_15, %c0_16] : memref<1x1xf32, #tpu.memory_space<vmem>>, vector<1x1xf32>
    %18 = vector.broadcast %17 : vector<1x1xf32> to vector<1x8xf32>
    %19 = arith.addf %16, %18 : vector<1x8xf32>
    %c0_17 = arith.constant 0 : index
    %c0_18 = arith.constant 0 : index
    %20 = vector.load %arg8[%c0_17, %c0_18] : memref<1x8xf32, #tpu.memory_space<vmem>>, vector<1x8xf32>
    tpu.vector_store %arg8[%c0_17, %c0_18], %19 {strides = array<i32>} : memref<1x8xf32, #tpu.memory_space<vmem>>, vector<1x8xf32>,
    return
  }
  func.func @transform_0(%arg0: i32) -> (i32, i32) {
    %c0_i32 = arith.constant 0 : i32
    %c0_i32_0 = arith.constant 0 : i32
    return %arg0, %c0_i32 : i32, i32
  }
  func.func @transform_1(%arg0: i32) -> (i32, i32) {
    %c0_i32 = arith.constant 0 : i32
    %c0_i32_0 = arith.constant 0 : i32
    %c0_i32_1 = arith.constant 0 : i32
    return %c0_i32, %c0_i32_0 : i32, i32
  }
  func.func @transform_2(%arg0: i32) -> (i32, i32) {
    %c0_i32 = arith.constant 0 : i32
    %c0_i32_0 = arith.constant 0 : i32
    %c0_i32_1 = arith.constant 0 : i32
    return %c0_i32, %c0_i32_0 : i32, i32
  }
  func.func @transform_3(%arg0: i32) -> (i32, i32) {
    %c0_i32 = arith.constant 0 : i32
    %c0_i32_0 = arith.constant 0 : i32
    %c0_i32_1 = arith.constant 0 : i32
    return %c0_i32, %c0_i32_0 : i32, i32
  }
  func.func @transform_4(%arg0: i32) -> (i32, i32) {
    %c0_i32 = arith.constant 0 : i32
    %c0_i32_0 = arith.constant 0 : i32
    %c0_i32_1 = arith.constant 0 : i32
    return %c0_i32, %c0_i32_0 : i32, i32
  }
  func.func @transform_5(%arg0: i32) -> (i32, i32) {
    %c0_i32 = arith.constant 0 : i32
    %c0_i32_0 = arith.constant 0 : i32
    %c0_i32_1 = arith.constant 0 : i32
    return %c0_i32, %c0_i32_0 : i32, i32
  }
  func.func @transform_6(%arg0: i32) -> (i32, i32) {
    %c0_i32 = arith.constant 0 : i32
    %c0_i32_0 = arith.constant 0 : i32
    %c0_i32_1 = arith.constant 0 : i32
    return %c0_i32, %c0_i32_0 : i32, i32
  }
  func.func @transform_7(%arg0: i32) -> (i32, i32) {
    %c0_i32 = arith.constant 0 : i32
    %c0_i32_0 = arith.constant 0 : i32
    return %c0_i32, %arg0 : i32, i32
  }
}

</mosaic_0001>

<bundles_post_ra>
// kernel: tpu_custom_call.1
= control target key start
LH: loop header
LB: loop body
LE: loop exit
PB: predicated region body
PF: predicated region fallthrough
CT: control target
= control target key end

     0   :  { %s509_s0 = inlined_call_operand.vmem [shape: f32[8,16], index: 0, kind: input, shape index: {}]   ;;  %s510_s1 = inlined_call_operand.vmem [shape: f32[16,64], index: 1, kind: input, shape index: {}]   ;;  %s511_s2 = inlined_call_operand.vmem [shape: f32[1,64], index: 2, kind: input, shape index: {}]   ;;  %s512_s3 = inlined_call_operand.vmem [shape: f32[64,32], index: 3, kind: input, shape index: {}]   ;;  %s513_s4 = inlined_call_operand.vmem [shape: f32[1,32], index: 4, kind: input, shape index: {}]   ;;  %s514_s5 = inlined_call_operand.vmem [shape: f32[1,32], index: 5, kind: input, shape index: {}]   ;;  %s515_s6 = inlined_call_operand.<no memory space> [shape: f32[1,1], index: 6, kind: input, shape index: {}]   ;;  %s516_s7 = inlined_call_operand.hbm [shape: f32[1,8], index: 7, kind: output, shape index: {}]  }
   0x1   :  { %v12_v0 = vstv %s515_s6 }
   0x2   :  { %13 = vst [vmem:[#allocation2] sm:$0x1] %v12_v0 }
   0x3   :  { %v30_v1 = vld [vmem:[%s510_s1] sm:$0xff]  ;;  %v31_v2 = vld [vmem:[%s510_s1 + $0x8] sm:$0xff]  ;;  %v404_v3 = vmov 0.0|0.0   ;;  %vm405_vm0 = vmmov 0   ;;  %v406_v5 = vmov 0.0   ;;  %v116_v8 = vld [vmem:[%s512_s3 + $0x10] sm:$0xff] }
   0x4   :  { %359 = vmatprep.subr.bf16.mxu0 %v404_v3  ;;  %v360_v4 = vpack.c.bf16 %v31_v2, %v30_v1  ;;  %332 = vmatprep.mubr.msk.f32.mxu0 %vm405_vm0, %v406_v5  ;;  %v114_v6 = vld [vmem:[%s512_s3] sm:$0xff]  ;;  %v115_v7 = vld [vmem:[%s512_s3 + $0x8] sm:$0xff]  ;;  %v117_v10 = vld [vmem:[%s512_s3 + $0x18] sm:$0xff]  ;;  %vm39_vm1 = vcmask 130048  }
   0x5   :  { %362 = vmatprep.subr.bf16.mxu1 %v404_v3  ;;  %v363_v9 = vpack.c.bf16 %v115_v7, %v114_v6  ;;  %351 = vmatprep.mubr.msk.f32.mxu1 %vm405_vm0, %v406_v5  ;;  %v29_v11 = vld [vmem:[%s509_s0] sm:$0xff] }
   0x6   :  { %361 = vmatpush3.bf16.msra.mxu0 %v360_v4 }
   0x7   :  { %14 = vsyncpa [#allocation4], 0  ;;  %364 = vmatpush3.bf16.msra.mxu1 %v363_v9  ;;  %v366_v12 = vpack.c.bf16 %v117_v10, %v116_v8  ;;  %354 = vmatprep.subr.mxu0 %v406_v5  ;;  %v118_v13 = vld [vmem:[%s512_s3 + $0x20] sm:$0xff]  ;;  %v119_v14 = vld [vmem:[%s512_s3 + $0x28] sm:$0xff]  ;;  %vm129_vm2 = vcmask 523264   ;;  %v407_v25 = vmov 0   ;;  %v211_v32 = vlaneseq }
   0x8   :  { %365 = vmatprep.subr.bf16.mxu1 %v404_v3  ;;  %v369_v15 = vpack.c.bf16 %v119_v14, %v118_v13  ;;  %v120_v16 = vld [vmem:[%s512_s3 + $0x30] sm:$0xff]  ;;  %v121_v17 = vld [vmem:[%s512_s3 + $0x38] sm:$0xff]  ;;  %v308_v19 = vld [vmem:[%s511_s2] ss:$0 sm:$0xff]  ;;  %379 = vset.pattern.permute.xlu0 %v407_v25  ;;  %vm215_vm3 = vcmask 261120   ;;  %s408_s26 = smov [#allocation3]  }
   0x9   :  { %333 = vmatmul.mubr.msk.f32.vlgmr.msra.gmra.mrb[0].mxu0 %vm39_vm1, %v29_v11  ;;  %v372_v18 = vpack.c.bf16 %v121_v17, %v120_v16  ;;  %v205_v24 = vld [vmem:[#allocation2] sm:$0x1]  ;;  %v212_v33 = vshrl.u32 %v211_v32, 7  ;;  %s300_s27 = sshll.u32 %s408_s26, 4  ;;  %vm292_vm4 = vcmask 57344   ;;  %s301_s27 = int_to_ptr.vmem [resolvable:$true] %s300_s27 }
   0xa   :  { %356 = vmatprep.mubr.msk.f32.mxu0 %vm405_vm0, %v406_v5  ;;  %208 = vperm.xlu0 %379, %v205_v24   ;;  %v310_v26 = vld [vmem:[%s513_s4] ss:$0 sm:$0xff]  ;;  %s380_s4 = scalar_lea.vmem %s301_s27, 16  ;;  %s384_s28 = scalar_lea.vmem %s301_s27, 32 }
   0xb   :  { %367 = vmatpush3.bf16.msra.mxu1 %v366_v12  ;;  %v204_v31 = vld [vmem:[%s514_s5] sm:$0x1]  ;;  %v213_v34 = vsub.s32 0, %v212_v33  ;;  %p381_p0 = scmp.ne.s32.totalorder %s301_s27, %s380_s4  ;;  %p385_p1 = scmp.lt.s32.totalorder %s301_s27, %s301_s27 }
   0xc   :  { %368 = vmatprep.subr.bf16.mxu1 %v404_v3  ;;  %p386_p2 = scmp.lt.s32.totalorder %s384_s28, %s380_s4 }
   0xe   :  { %p387_p3 = por %p386_p2, %p385_p1 }
   0xf   :  { %370 = vmatpush3.bf16.msra.mxu1 %v369_v15 }
  0x10   :  { %371 = vmatprep.subr.bf16.mxu1 %v404_v3  ;;  %p388_p4 = pnand %p387_p3, %p381_p0 }
  0x13   :  { %373 = vmatpush3.bf16.msra.mxu1 %v372_v18 }
  0x89   :  { %v209_v35 = vpop.permute.xlu0 %208 }
  0x8a   :  { %v214_v36 = vrot.slane %v209_v35, %v213_v34 }
  0xdc   :  { %v109_v20 = vpop.f32.mrb[0].mxu0 }
  0xdd   :  { %v110_v21 = vadd.f32 %v308_v19, %v109_v20  ;;  %v334_v22 = vpop.f32.mrb[1].mxu0 }
  0xdf   :  { %v113_v23 = vmax.f32 %v110_v21, 0.0 }
  0xe1   :  { %352 = vmatmul.mubr.msk.f32.vlgmr.msra.gmra.mrb[0].mxu1 %vm129_vm2, %v113_v23 }
 0x1b4   :  { %v199_v27 = vpop.f32.mrb[0].mxu1 }
 0x1b5   :  { %v200_v28 = vadd.f32 %v310_v26, %v199_v27  ;;  %v353_v29 = vpop.f32.mrb[1].mxu1 }
 0x1b7   :  { %v203_v30 = vmax.f32 %v200_v28, 0.0 }
 0x1b9   :  { %355 = vmatpush3.xpose.msk.msra.mxu0 %vm215_vm3, %v203_v30 }
 0x1bc   :  { %357 = vmatmul.mubr.msk.f32.vlgmr.msra.gmra.mrb[2].mxu0 %vm215_vm3, %v204_v31 }
 0x28f   :  { %v288_v37 = vpop.f32.mrb[2].mxu0 }
 0x290   :  { %v289_v38 = vadd.f32 %v288_v37, %v214_v36  ;;  %v358_v39 = vpop.f32.mrb[3].mxu0 }
 0x292   :  { %293 = vst.msk [vmem:[#allocation3] sm:$0x1] %vm292_vm4, %v289_v38 }
 0x293   :  { %391 = shalt.err (!%p388_p4)
}
 0x294   :  { %s392_s30 = scalar_lea.hbm %s516_s7, 16 }
 0x295   :  { %p393_p5 = scmp.ne.s32.totalorder %s516_s7, %s392_s30  ;;  %p396_p6 = scmp.lt.u32.totalorder %s392_s30, %s516_s7 }
 0x297   :  { %p398_p7 = pnand %p396_p6, %p393_p5 }
 0x299   :  { %401 = shalt.err (!%p398_p7)
}
 0x29a   :  { %303 = dma.vmem_to_hbm [thread:$0]  %s301_s27, 16, %s516_s7, [#allocation4]  }
 0x29b   :  { %402 = dma.done.wait [#allocation4], 16  }
 0x29c   :  { %403 = vsyncadd [#allocation4], 4294967280 }
 0x29d   :  { %307 = vsyncpa [#allocation4], 1 }

</bundles_post_ra>
